<compile_context>
chip_gen: v7x
topology: tpu7x:2x2x1
jax: 0.10.0
libtpu: 0.0.40
codegen_flags: <defaults>
</compile_context>

<pallas_src>
import math

import jax
import jax.numpy as jnp
from jax.experimental import pallas as pl
from jax.experimental.pallas import tpu as pltpu


def _round_up(x, m):
    return ((x + m - 1) // m) * m


def graphsage_kernel(feat_self_ref, adj_ref, feat_k_ref,
                     w_self_t_ref, w_neigh_t_ref, w_cls_t_ref,
                     out_ref, neigh_acc):
    k = pl.program_id(1)

    @pl.when(k == 0)
    def _():
        neigh_acc[...] = jnp.zeros_like(neigh_acc)

    # Mean aggregation partial product: (tm, tk)bf16 @ (tk, F)bf16 -> f32 accumulate.
    neigh_acc[...] += jnp.dot(adj_ref[...], feat_k_ref[...],
                              preferred_element_type=jnp.float32)

    @pl.when(k == pl.num_programs(1) - 1)
    def _():
        # Encoder: embeds.T = relu(feats @ W_self.T + neigh @ W_neigh.T)  (f32)
        z = (jnp.dot(feat_self_ref[...], w_self_t_ref[...],
                     preferred_element_type=jnp.float32)
             + jnp.dot(neigh_acc[...], w_neigh_t_ref[...],
                       preferred_element_type=jnp.float32))
        embeds_t = jnp.maximum(z, 0.0)
        # Classifier head: scores.T = embeds.T @ W_cls.T  (lane-dense padded C)
        out_ref[...] = jnp.dot(embeds_t, w_cls_t_ref[...],
                               preferred_element_type=jnp.float32)


def graphsage_forward(feats, adj, w_self, w_neigh, w_cls, *, tm=128, tk=128):
    N, F = feats.shape
    D = w_self.shape[0]
    C = w_cls.shape[0]
    LANE = 128

    n_pad = _round_up(N, math.lcm(tm, tk))
    f_pad = _round_up(F, LANE)
    d_pad = _round_up(D, LANE)
    c_pad = _round_up(C, LANE)

    # Zero-padded, layout-friendly operands (glue work stays in XLA).
    feats_p = jnp.zeros((n_pad, f_pad), jnp.float32).at[:N, :F].set(feats)
    feats_k = feats_p.astype(jnp.bfloat16)                 # contraction operand (bf16)
    adj_p = jnp.zeros((n_pad, n_pad), jnp.bfloat16).at[:N, :N].set(
        adj.astype(jnp.bfloat16))                          # dominant N^2 stream in bf16
    w_self_t = jnp.zeros((f_pad, d_pad), jnp.float32).at[:F, :D].set(w_self.T)
    w_neigh_t = jnp.zeros((f_pad, d_pad), jnp.float32).at[:F, :D].set(w_neigh.T)
    w_cls_t = jnp.zeros((d_pad, c_pad), jnp.float32).at[:D, :C].set(w_cls.T)

    grid = (n_pad // tm, n_pad // tk)

    flops = (2 * n_pad * n_pad * f_pad        # aggregation
             + 4 * n_pad * f_pad * d_pad      # encoder (two matmuls)
             + 2 * n_pad * d_pad * c_pad)     # classifier
    bytes_accessed = (2 * n_pad * n_pad                         # adj (bf16)
                      + (n_pad // tm) * n_pad * f_pad * 2       # re-streamed feats_k (bf16)
                      + n_pad * f_pad * 4                       # feats_self (f32)
                      + 2 * f_pad * d_pad * 4 + d_pad * c_pad * 4
                      + n_pad * c_pad * 4)                      # output

    out_p = pl.pallas_call(
        graphsage_kernel,
        out_shape=jax.ShapeDtypeStruct((n_pad, c_pad), jnp.float32),
        grid_spec=pltpu.PrefetchScalarGridSpec(
            num_scalar_prefetch=0,
            grid=grid,
            in_specs=[
                pl.BlockSpec((tm, f_pad), lambda i, k: (i, 0)),    # self-feature row tile (f32)
                pl.BlockSpec((tm, tk), lambda i, k: (i, k)),       # adjacency tile (bf16)
                pl.BlockSpec((tk, f_pad), lambda i, k: (k, 0)),    # neighbor-feature tile (bf16)
                pl.BlockSpec((f_pad, d_pad), lambda i, k: (0, 0)),  # resident weights
                pl.BlockSpec((f_pad, d_pad), lambda i, k: (0, 0)),
                pl.BlockSpec((d_pad, c_pad), lambda i, k: (0, 0)),
            ],
            out_specs=pl.BlockSpec((tm, c_pad), lambda i, k: (i, 0)),
            scratch_shapes=[pltpu.VMEM((tm, f_pad), jnp.float32)],  # neigh accumulator
        ),
        compiler_params=pltpu.CompilerParams(
            dimension_semantics=("parallel", "arbitrary"),
        ),
        cost_estimate=pl.CostEstimate(
            flops=flops, transcendentals=0, bytes_accessed=bytes_accessed),
    )(feats_p, adj_p, feats_k, w_self_t, w_neigh_t, w_cls_t)

    return out_p[:N, :C]


def reference_forward(feats, adj, w_self, w_neigh, w_cls):
    # Pure-f32 JAX reference mirroring the PyTorch graph.
    neigh = adj @ feats                                     # (N, F)
    combined = jnp.concatenate([feats, neigh], axis=1)      # (N, 2F)
    w_enc = jnp.concatenate([w_self, w_neigh], axis=1)      # (D, 2F)
    embeds = jax.nn.relu(w_enc @ combined.T)                # (D, N)
    scores = w_cls @ embeds                                 # (C, N)
    return scores.T                                         # (N, C)


if __name__ == "__main__":
    key = jax.random.PRNGKey(0)
    # num_nodes (non-multiple of the 128 tile to exercise padding + a 3x3 grid),
    # feat_dim, embed_dim, num_classes.
    N, F, D, C = 300, 32, 32, 4

    k_feat, k_adj, k_self, k_neigh, k_cls = jax.random.split(key, 5)

    feats = jax.random.normal(k_feat, (N, F), dtype=jnp.float32)

    # Deterministic random graph: binary adjacency + self loops, row-normalized (mean aggregation).
    adj_bin = (jax.random.uniform(k_adj, (N, N)) < 0.3).astype(jnp.float32)
    adj_bin = adj_bin + jnp.eye(N, dtype=jnp.float32)
    adj = adj_bin / jnp.sum(adj_bin, axis=1, keepdims=True)

    # Encoder weight W_enc: (embed_dim, 2*feat_dim), xavier-uniform; split into self/neigh halves.
    bound_enc = (6.0 / (D + 2 * F)) ** 0.5
    w_self = jax.random.uniform(k_self, (D, F), minval=-bound_enc, maxval=bound_enc, dtype=jnp.float32)
    w_neigh = jax.random.uniform(k_neigh, (D, F), minval=-bound_enc, maxval=bound_enc, dtype=jnp.float32)

    # GraphSage classifier weight: (num_classes, embed_dim), xavier-uniform.
    bound_cls = (6.0 / (C + D)) ** 0.5
    w_cls = jax.random.uniform(k_cls, (C, D), minval=-bound_cls, maxval=bound_cls, dtype=jnp.float32)

    out = graphsage_forward(feats, adj, w_self, w_neigh, w_cls, tm=128, tk=128)
    out = jax.block_until_ready(out)

    ref = reference_forward(feats, adj, w_self, w_neigh, w_cls)
    assert out.shape == (N, C), out.shape
    # bf16 adjacency/feature stream with f32 accumulation -> small relative error vs pure f32.
    assert jnp.allclose(out, ref, atol=2e-2, rtol=2e-2), float(jnp.max(jnp.abs(out - ref)))

    # TODO(synk): CrossEntropyLoss (self.loss) and sigmoid (to_prob) are training/inference
    # heads outside forward(); not implemented in the kernel.
    # TODO(synk): for large sparse graphs, replace the dense (N,N) aggregation with a
    # scalar-prefetch neighbor-index gather (PrefetchScalarGridSpec + manual DMA gather).
    print("KERNEL_OK")
</pallas_src>

<mosaic_0001>
module attributes {stable_mosaic.version = 11 : i64} {
  func.func @graphsage_kernel(%arg0: i32, %arg1: i32, %arg2: memref<128x128xf32, #tpu.memory_space<vmem>>, %arg3: memref<128x128xbf16, #tpu.memory_space<vmem>>, %arg4: memref<128x128xbf16, #tpu.memory_space<vmem>>, %arg5: memref<128x128xf32, #tpu.memory_space<vmem>>, %arg6: memref<128x128xf32, #tpu.memory_space<vmem>>, %arg7: memref<128x128xf32, #tpu.memory_space<vmem>>, %arg8: memref<128x128xf32, #tpu.memory_space<vmem>>, %arg9: memref<128x128xf32, #tpu.memory_space<vmem>>) attributes {dimension_semantics = [#tpu.dimension_semantics<parallel>, #tpu.dimension_semantics<arbitrary>], iteration_bounds = array<i64: 3, 3>, scalar_prefetch = 0 : i64, scratch_operands = 1 : i64, tpu.core_type = #tpu.core_type<tc>, window_params = [{transform_indices = @transform_0, window_bounds = array<i64: 128, 128>}, {transform_indices = @transform_1, window_bounds = array<i64: 128, 128>}, {transform_indices = @transform_2, window_bounds = array<i64: 128, 128>}, {pipeline_mode = #tpu.pipeline_mode<synchronous>, transform_indices = @transform_3, window_bounds = array<i64: 128, 128>}, {pipeline_mode = #tpu.pipeline_mode<synchronous>, transform_indices = @transform_4, window_bounds = array<i64: 128, 128>}, {pipeline_mode = #tpu.pipeline_mode<synchronous>, transform_indices = @transform_5, window_bounds = array<i64: 128, 128>}, {transform_indices = @transform_6, window_bounds = array<i64: 128, 128>}]} {
    %c0_i32 = arith.constant 0 : i32
    %0 = arith.cmpi eq, %arg1, %c0_i32 : i32
    %1 = arith.extui %0 : i1 to i32
    %c0_i32_0 = arith.constant 0 : i32
    %2 = arith.cmpi ne, %1, %c0_i32_0 : i32
    scf.if %2 {
      %cst_9 = arith.constant 0.000000e+00 : f32
      %12 = vector.broadcast %cst_9 : f32 to vector<128x128xf32>
      %c0_10 = arith.constant 0 : index
      %c0_11 = arith.constant 0 : index
      %13 = vector.load %arg9[%c0_10, %c0_11] : memref<128x128xf32, #tpu.memory_space<vmem>>, vector<128x128xf32>
      tpu.vector_store %arg9[%c0_10, %c0_11], %12 {strides = array<i32>} : memref<128x128xf32, #tpu.memory_space<vmem>>, vector<128x128xf32>,
    } else {
    }
    %c0 = arith.constant 0 : index
    %c0_1 = arith.constant 0 : index
    %3 = vector.load %arg9[%c0, %c0_1] : memref<128x128xf32, #tpu.memory_space<vmem>>, vector<128x128xf32>
    %c0_2 = arith.constant 0 : index
    %c0_3 = arith.constant 0 : index
    %4 = vector.load %arg3[%c0_2, %c0_3] : memref<128x128xbf16, #tpu.memory_space<vmem>>, vector<128x128xbf16>
    %c0_4 = arith.constant 0 : index
    %c0_5 = arith.constant 0 : index
    %5 = vector.load %arg4[%c0_4, %c0_5] : memref<128x128xbf16, #tpu.memory_space<vmem>>, vector<128x128xbf16>
    %cst = arith.constant dense<0.000000e+00> : vector<128x128xf32>
    %6 = tpu.matmul %4, %5, %cst {dimension_numbers = #tpu.dot_dimension_numbers<[1], [0], [0], [1], [0, 0, 1, 1], [], []>} : vector<128x128xbf16>, vector<128x128xbf16>, vector<128x128xf32> -> vector<128x128xf32>
    %7 = arith.addf %3, %6 : vector<128x128xf32>
    %c0_6 = arith.constant 0 : index
    %c0_7 = arith.constant 0 : index
    %8 = vector.load %arg9[%c0_6, %c0_7] : memref<128x128xf32, #tpu.memory_space<vmem>>, vector<128x128xf32>
    tpu.vector_store %arg9[%c0_6, %c0_7], %7 {strides = array<i32>} : memref<128x128xf32, #tpu.memory_space<vmem>>, vector<128x128xf32>,
    %c2_i32 = arith.constant 2 : i32
    %9 = arith.cmpi eq, %arg1, %c2_i32 : i32
    %10 = arith.extui %9 : i1 to i32
    %c0_i32_8 = arith.constant 0 : i32
    %11 = arith.cmpi ne, %10, %c0_i32_8 : i32
    scf.if %11 {
      %c0_9 = arith.constant 0 : index
      %c0_10 = arith.constant 0 : index
      %12 = vector.load %arg2[%c0_9, %c0_10] : memref<128x128xf32, #tpu.memory_space<vmem>>, vector<128x128xf32>
      %c0_11 = arith.constant 0 : index
      %c0_12 = arith.constant 0 : index
      %13 = vector.load %arg5[%c0_11, %c0_12] : memref<128x128xf32, #tpu.memory_space<vmem>>, vector<128x128xf32>
      %cst_13 = arith.constant dense<0.000000e+00> : vector<128x128xf32>
      %14 = tpu.matmul %12, %13, %cst_13 {dimension_numbers = #tpu.dot_dimension_numbers<[1], [0], [0], [1], [0, 0, 1, 1], [], []>} : vector<128x128xf32>, vector<128x128xf32>, vector<128x128xf32> -> vector<128x128xf32>
      %c0_14 = arith.constant 0 : index
      %c0_15 = arith.constant 0 : index
      %15 = vector.load %arg9[%c0_14, %c0_15] : memref<128x128xf32, #tpu.memory_space<vmem>>, vector<128x128xf32>
      %c0_16 = arith.constant 0 : index
      %c0_17 = arith.constant 0 : index
      %16 = vector.load %arg6[%c0_16, %c0_17] : memref<128x128xf32, #tpu.memory_space<vmem>>, vector<128x128xf32>
      %cst_18 = arith.constant dense<0.000000e+00> : vector<128x128xf32>
      %17 = tpu.matmul %15, %16, %cst_18 {dimension_numbers = #tpu.dot_dimension_numbers<[1], [0], [0], [1], [0, 0, 1, 1], [], []>} : vector<128x128xf32>, vector<128x128xf32>, vector<128x128xf32> -> vector<128x128xf32>
      %18 = arith.addf %14, %17 : vector<128x128xf32>
      %cst_19 = arith.constant 0.000000e+00 : f32
      %19 = vector.broadcast %cst_19 : f32 to vector<128x128xf32>
      %20 = arith.maximumf %18, %19 : vector<128x128xf32>
      %c0_20 = arith.constant 0 : index
      %c0_21 = arith.constant 0 : index
      %21 = vector.load %arg7[%c0_20, %c0_21] : memref<128x128xf32, #tpu.memory_space<vmem>>, vector<128x128xf32>
      %cst_22 = arith.constant dense<0.000000e+00> : vector<128x128xf32>
      %22 = tpu.matmul %20, %21, %cst_22 {dimension_numbers = #tpu.dot_dimension_numbers<[1], [0], [0], [1], [0, 0, 1, 1], [], []>} : vector<128x128xf32>, vector<128x128xf32>, vector<128x128xf32> -> vector<128x128xf32>
      %c0_23 = arith.constant 0 : index
      %c0_24 = arith.constant 0 : index
      %23 = vector.load %arg8[%c0_23, %c0_24] : memref<128x128xf32, #tpu.memory_space<vmem>>, vector<128x128xf32>
      tpu.vector_store %arg8[%c0_23, %c0_24], %22 {strides = array<i32>} : memref<128x128xf32, #tpu.memory_space<vmem>>, vector<128x128xf32>,
    } else {
    }
    return
  }
  func.func @transform_0(%arg0: i32, %arg1: i32) -> (i32, i32) {
    %c0_i32 = arith.constant 0 : i32
    %c0_i32_0 = arith.constant 0 : i32
    return %arg0, %c0_i32 : i32, i32
  }
  func.func @transform_1(%arg0: i32, %arg1: i32) -> (i32, i32) {
    %c0_i32 = arith.constant 0 : i32
    return %arg0, %arg1 : i32, i32
  }
  func.func @transform_2(%arg0: i32, %arg1: i32) -> (i32, i32) {
    %c0_i32 = arith.constant 0 : i32
    %c0_i32_0 = arith.constant 0 : i32
    return %arg1, %c0_i32 : i32, i32
  }
  func.func @transform_3(%arg0: i32, %arg1: i32) -> (i32, i32) {
    %c0_i32 = arith.constant 0 : i32
    %c0_i32_0 = arith.constant 0 : i32
    %c0_i32_1 = arith.constant 0 : i32
    return %c0_i32, %c0_i32_0 : i32, i32
  }
  func.func @transform_4(%arg0: i32, %arg1: i32) -> (i32, i32) {
    %c0_i32 = arith.constant 0 : i32
    %c0_i32_0 = arith.constant 0 : i32
    %c0_i32_1 = arith.constant 0 : i32
    return %c0_i32, %c0_i32_0 : i32, i32
  }
  func.func @transform_5(%arg0: i32, %arg1: i32) -> (i32, i32) {
    %c0_i32 = arith.constant 0 : i32
    %c0_i32_0 = arith.constant 0 : i32
    %c0_i32_1 = arith.constant 0 : i32
    return %c0_i32, %c0_i32_0 : i32, i32
  }
  func.func @transform_6(%arg0: i32, %arg1: i32) -> (i32, i32) {
    %c0_i32 = arith.constant 0 : i32
    %c0_i32_0 = arith.constant 0 : i32
    return %arg0, %c0_i32 : i32, i32
  }
}

</mosaic_0001>

<bundles_post_ra>
// kernel: tpu_custom_call.1
= control target key start
LH: loop header
LB: loop body
LE: loop exit
PB: predicated region body
PF: predicated region fallthrough
CT: control target
= control target key end

     0   :  { %s3062_s0 = inlined_call_operand.hbm [shape: f32[384,128], index: 0, kind: input, shape index: {}]   ;;  %s3063_s1 = inlined_call_operand.hbm [shape: bf16[384,384], index: 1, kind: input, shape index: {}]   ;;  %s3064_s2 = inlined_call_operand.hbm [shape: bf16[384,128], index: 2, kind: input, shape index: {}]   ;;  %s3065_s3 = inlined_call_operand.hbm [shape: f32[128,128], index: 3, kind: input, shape index: {}]   ;;  %s3066_s4 = inlined_call_operand.hbm [shape: f32[128,128], index: 4, kind: input, shape index: {}]   ;;  %s3067_s5 = inlined_call_operand.hbm [shape: f32[128,128], index: 5, kind: input, shape index: {}]   ;;  %s3068_s6 = inlined_call_operand.hbm [shape: f32[384,128], index: 6, kind: output, shape index: {}]  }
   0x1   :  { %3097 = sst [smem:[#allocation33_spill]] %s3062_s0 }
   0x2   :  { %3098 = sst [smem:[#allocation34_spill]] %s3063_s1 }
   0x3   :  { %3099 = sst [smem:[#allocation35_spill]] %s3064_s2 }
   0x4   :  { %3100 = sst [smem:[#allocation36_spill]] %s3065_s3 }
   0x5   :  { %3101 = sst [smem:[#allocation37_spill]] %s3066_s4 }
   0x6   :  { %3102 = sst [smem:[#allocation38_spill]] %s3067_s5 }
   0x7   :  { %3103 = sst [smem:[#allocation39_spill]] %s3068_s6 }
   0x8   :  { %11 = vsyncpa [#allocation4], 0 }
   0x9   :  { %13 = vsyncpa [#allocation4 + $0x1], 0 }
   0xa   :  { %14 = vsyncpa [#allocation7], 0 }
   0xb   :  { %16 = vsyncpa [#allocation7 + $0x1], 0 }
   0xc   :  { %17 = vsyncpa [#allocation10], 0 }
   0xd   :  { %18 = vsyncpa [#allocation13], 0 }
   0xe   :  { %19 = vsyncpa [#allocation5], 0 }
   0xf   :  { %21 = vsyncpa [#allocation5 + $0x1], 0  ;;  %s2499_s21 = smov 0   ;;  %s2501_s22 = smov 0  }
  0x10   :  { %s2503_s23 = smov 0   ;;  %s2505_s24 = smov 0  }
  0x11   :  { %s2507_s25 = smov 0   ;;  %s2509_s26 = smov 0  }
  0x12   :  { %s2511_s27 = smov 0   ;;  %s2513_s28 = smov 0  }
  0x13   :  { %s2515_s29 = smov 0   ;;  %s2517_s30 = smov 0  }
  0x14   :  { %s2519_s7 = smov 0   ;;  %s2521_s8 = smov 0  }
  0x15   :  { %s2523_s9 = smov 0   ;;  %s2525_s10 = smov 0  }
  0x16 LB: > { %3104 = sst [smem:[#allocation21_spill]] %s2395_s21  ;;  %s2570_s11 = sadd.s32 4294967295, %s2447_s10   ;;  %s2447_s10 = sphi %s2525_s10, %s27_s10   ;;  %s2443_s9 = sphi %s2523_s9, %s3188_s9   ;;  %s2439_s8 = sphi %s2521_s8, %s3187_s8   ;;  %s2435_s7 = sphi %s2519_s7, %s3176_s7   ;;  %s2431_s30 = sphi %s2517_s30, %s3186_s30   ;;  %s2427_s29 = sphi %s2515_s29, %s3185_s29   ;;  %s2423_s28 = sphi %s2513_s28, %s3184_s28   ;;  %s2419_s27 = sphi %s2511_s27, %s3183_s27   ;;  %s2415_s26 = sphi %s2509_s26, %s3182_s26   ;;  %s2411_s25 = sphi %s2507_s25, %s3181_s25   ;;  %s2407_s24 = sphi %s2505_s24, %s3173_s24   ;;  %s2403_s23 = sphi %s2503_s23, %s3180_s23   ;;  %s2399_s22 = sphi %s2501_s22, %s3172_s22   ;;  %s2395_s21 = sphi %s2499_s21, %s3171_s21  }
  0x17   : > { %3105 = sst [smem:[#allocation22_spill]] %s2399_s22  ;;  %p1430_p0 = scmp.ge.s32.totalorder %s2447_s10, 1 }
  0x18   : > { %3106 = sst [smem:[#allocation23_spill]] %s2403_s23  ;;  %p3070_p1 = scmp.eq.s32.totalorder %s2570_s11, 0 }
  0x19   : > { %3107 = sst [smem:[#allocation24_spill]] %s2411_s25  ;;  %p213_p3 = scmp.lt.s32.totalorder %s2447_s10, 10 }
  0x1a   : > { %3108 = sst [smem:[#allocation25_spill]] %s2431_s30  ;;  %s2449_s13 = smov [#allocation9]  }
  0x1b   : > { %3109 = sst [smem:[#allocation26_spill]] %s2435_s7  ;;  %p2576_p4 = pnand %p1430_p0, %p213_p3 }
  0x1c   : > { %3110 = sst [smem:[#allocation27_spill]] %s2443_s9  ;;  %s225_s14 = sshll.u32 %s2449_s13, 4  ;;  %s226_s14 = int_to_ptr.vmem [resolvable:$true] %s225_s14 }
  0x1d   : > { %s3111_s12 = scalar_select %p2576_p4, 1, 0 }
  0x1e   : > { %p1940_p5 = pneg %p2576_p4  ;;  %s3114_s3 = sld [smem:[#allocation36_spill]] }
  0x1f   : > { %3112 = sst [smem:[#allocation28_spill]] %s3111_s12 }
  0x20   : > { %p2584_p6 = pnand %p1940_p5, %p3070_p1 }
  0x22   : > { %s3113_s15 = scalar_select %p2584_p6, 1, 0 }
  0x23   : > { %p2596_p8 = pneg %p2584_p6 }
  0x24   : > { %s2111_s18 = scalar_lea.hbm %s3114_s3, 2048 }
  0x25   : > { %p2112_p7 = scmp.ne.s32.totalorder %s3114_s3, %s2111_s18  ;;  %p2118_p11 = scmp.lt.u32.totalorder %s2111_s18, %s3114_s3 }
  0x27   : > { %p2114_p9 = pnand %p2596_p8, %p2112_p7 }
  0x29   : > { %p2115_p10 = pneg %p2114_p9 }
  0x2b   : > { %p2120_p12 = pnand %p2118_p11, %p2115_p10 }
  0x2d   : > { %2123 = shalt.err (!%p2120_p12)
}
  0x2e   : > { %s2124_s16 = scalar_lea.vmem %s226_s14, 2048  ;;  %p2132_p5 = scmp.lt.s32.totalorder %s226_s14, %s226_s14 }
  0x2f   : > { %p2125_p13 = scmp.ne.s32.totalorder %s226_s14, %s2124_s16  ;;  %p2133_p2 = scmp.lt.s32.totalorder %s2124_s16, %s2124_s16 }
  0x31   : > { %p2127_p0 = pnand %p2125_p13, %p2596_p8  ;;  %p2134_p1 = por %p2133_p2, %p2132_p5 }
  0x33   : > { %p2128_p3 = pneg %p2127_p0 }
  0x35   : > { %p2135_p4 = pnand %p2134_p1, %p2128_p3 }
  0x37   : > { %2138 = shalt.err (!%p2135_p4)
}
  0x38   : > { %s3072_s17 = smov 128   ;;  %s3074_s6 = smov 8  }
  0x39   : > { %1943 = dma.hbm_to_vmem [thread:$0]  (!%p2584_p6), %s3114_s3, 2048, %s226_s14, [#allocation10], %s3072_s17, %s3072_s17, %s3074_s6  }
  0x3a   : > { %s36_s19 = sadd.s32 1, %s2439_s8  ;;  %s39_s20 = sadd.s32 1, %s2443_s9 }
  0x3b   : > { %p37_p1 = scmp.ge.s32.totalorder %s36_s19, 3  ;;  %p3086_p2 = scmp.eq.s32.totalorder %s2447_s10, 0 }
  0x3c   : > { %s74_s16 = sadd.s32 1, %s2415_s26  ;;  %p81_p4 = scmp.ne.s32.totalorder %s2415_s26, %s2411_s25 }
  0x3d   : > { %s3190_s19 = smov (%p37_p1, %s36_s19), 0  ;;  %s3192_s20 = smov (!%p37_p1, %s39_s20), %s2443_s9 }
  0x3e   : > { %3116 = sst [smem:[#allocation29_spill]] %s3190_s19  ;;  %s2626_s30 = ssub.s32 %s2439_s8, %s3190_s19 }
  0x3f   : > { %p2630_p7 = por %p81_p4, %p3086_p2  ;;  %p41_p9 = scmp.ge.s32.totalorder %s3192_s20, 3 }
  0x40   : > { %p87_p10 = scmp.ne.s32.totalorder %s2411_s25, %s2407_s24  ;;  %p3085_p12 = scmp.lt.s32.totalorder %s2447_s10, 9 }
  0x41   : > { %s3194_s20 = smov (%p41_p9, %s3192_s20), 0  ;;  %p3119_p13 = scmp.eq.s32.totalorder %s2570_s11, 0 }
  0x42   : > { %3118 = sst [smem:[#allocation30_spill]] %s3194_s20  ;;  %s286_s18 = sand.u32 1, %s2447_s10  }
  0x43   : > { %p2642_p0 = por %p87_p10, %p3119_p13  ;;  %s2649_s17 = ssub.s32 %s2443_s9, %s3194_s20 }
  0x44   : > { %s71_s6 = sor.u32 %s2626_s30, %s2649_s17  ;;  %s288_s3 = sand.u32 1, %s2415_s26  }
  0x45   : > { %s3120_s7 = scalar_select %p2642_p0, 1, 0 }
  0x46   : > { %p72_p3 = scmp.eq.s32.totalorder %s71_s6, 0  ;;  %s1438_s24 = sshll.u32 %s288_s3, 6 }
  0x47   : > { %3121 = sst [smem:[#allocation31_spill]] %s3120_s7  ;;  %s1919_s19 = smul.u32 48, %s2443_s9 }
  0x48   : > { %s2656_s25 = scalar_select %p72_p3, %s2415_s26, %s74_s16  }
  0x49   : > { %s296_s12 = sadd.s32 %s2439_s8, %s1919_s19  ;;  %s290_s2 = scalar_lea.vmem [#allocation6], %s1438_s24 }
  0x4a   : > { %s299_s21 = sshll.u32 %s290_s2, 4  ;;  %s1441_s22 = sshll.u32 %s296_s12, 6  ;;  %s2659_s21 = int_to_ptr.vmem [resolvable:$true] %s299_s21 }
  0x4b   : > { %s3122_s1 = sld [smem:[#allocation34_spill]]  ;;  %p2670_p5 = pnand %p3085_p12, %p2630_p7 }
  0x4c   : > { %s2674_s2 = scalar_lea.sflag [#allocation7], %s286_s18 }
  0x4d   : > { %p2141_p4 = pneg %p2670_p5 }
  0x51   : > { %s2664_s7 = scalar_lea.hbm %s3122_s1, %s1441_s22  ;;  %s2144_s23 = scalar_lea.hbm %s3122_s1, 9216 }
  0x52   : > { %s2139_s12 = scalar_lea.hbm %s2664_s7, 1024  ;;  %p2145_p7 = scmp.lt.u32.totalorder %s2664_s7, %s3122_s1 }
  0x53   : > { %p2140_p1 = scmp.ne.s32.totalorder %s2664_s7, %s2139_s12  ;;  %p2146_p13 = scmp.lt.u32.totalorder %s2144_s23, %s2139_s12 }
  0x54   : > { %p2148_p11 = scmp.lt.u32.totalorder %s2139_s12, %s2664_s7 }
  0x55   : > { %p2142_p9 = pnand %p2141_p4, %p2140_p1  ;;  %p2147_p3 = por %p2146_p13, %p2145_p7 }
  0x57   : > { %p2143_p10 = pneg %p2142_p9  ;;  %p2149_p12 = por %p2148_p11, %p2147_p3 }
  0x59   : > { %p2150_p2 = pnand %p2149_p12, %p2143_p10 }
  0x5b   : > { %2153 = shalt.err (!%p2150_p2)
}
  0x5c   : > { %s2154_s16 = scalar_lea.vmem %s2659_s21, 1024  ;;  %s2452_s14 = smov [#allocation6]  }
  0x5d   : > { %p2155_p1 = scmp.ne.s32.totalorder %s2659_s21, %s2154_s16  ;;  %s2159_s18 = sshll.u32 %s2452_s14, 4  ;;  %s2160_s18 = int_to_ptr.vmem [resolvable:$false] %s2159_s18 }
  0x5e   : > { %s2161_s24 = scalar_lea.vmem %s2160_s18, 2048  ;;  %p2162_p6 = scmp.lt.s32.totalorder %s2659_s21, %s2160_s18 }
  0x5f   : > { %p2157_p9 = pnand %p2155_p1, %p2141_p4  ;;  %p2163_p7 = scmp.lt.s32.totalorder %s2161_s24, %s2154_s16 }
  0x61   : > { %p2158_p0 = pneg %p2157_p9  ;;  %p2164_p13 = por %p2163_p7, %p2162_p6 }
  0x63   : > { %p2165_p11 = pnand %p2164_p13, %p2158_p0 }
  0x65   : > { %2168 = shalt.err (!%p2165_p11)
}
  0x66   : > { %s2453_s12 = smov 192   ;;  %s3091_s0 = smov 64  }
  0x67   : > { %s3092_s22 = smov 4   ;;  %s2456_s23 = smov [#allocation11]  }
  0x68   : > { %1956 = dma.hbm_to_vmem [thread:$0]  (!%p2670_p5), %s2664_s7, 1024, %s2659_s21, %s2674_s2, %s2453_s12, %s3091_s0, %s3092_s22  }
  0x69   : > { %s238_s6 = sshll.u32 %s2456_s23, 4  ;;  %s2457_s19 = smov [#allocation12]   ;;  %s239_s6 = int_to_ptr.vmem [resolvable:$true] %s238_s6 }
  0x6a   : > { %s251_s14 = sshll.u32 %s2457_s19, 4  ;;  %s3124_s4 = sld [smem:[#allocation37_spill]]  ;;  %s2704_s14 = int_to_ptr.vmem [resolvable:$true] %s251_s14 }
  0x70   : > { %s2169_s24 = scalar_lea.hbm %s3124_s4, 2048 }
  0x71   : > { %p2170_p6 = scmp.ne.s32.totalorder %s3124_s4, %s2169_s24  ;;  %p2176_p0 = scmp.lt.u32.totalorder %s2169_s24, %s3124_s4 }
  0x73   : > { %p2172_p2 = pnand %p2170_p6, %p2596_p8 }
  0x75   : > { %p2173_p12 = pneg %p2172_p2 }
  0x77   : > { %p2178_p5 = pnand %p2176_p0, %p2173_p12 }
  0x79   : > { %2181 = shalt.err (!%p2178_p5)
}
  0x7a   : > { %s2182_s7 = scalar_lea.vmem %s239_s6, 2048  ;;  %p2190_p1 = scmp.lt.s32.totalorder %s239_s6, %s239_s6 }
  0x7b   : > { %p2183_p4 = scmp.ne.s32.totalorder %s239_s6, %s2182_s7  ;;  %p2191_p9 = scmp.lt.s32.totalorder %s2182_s7, %s2182_s7 }
  0x7d   : > { %p2185_p10 = pnand %p2183_p4, %p2596_p8  ;;  %p2192_p7 = por %p2191_p9, %p2190_p1 }
  0x7f   : > { %p2186_p3 = pneg %p2185_p10 }
  0x81   : > { %p2193_p13 = pnand %p2192_p7, %p2186_p3 }
  0x83   : > { %2196 = shalt.err (!%p2193_p13)
}
  0x84   : > { %p3125_p11 = scmp.ne.s32.totalorder %s3113_s15, 0  ;;  %s3126_s1 = smov 8  }
  0x85   : > { %s3127_s20 = smov 128   ;;  %s3128_s5 = sld [smem:[#allocation38_spill]] }
  0x86   : > { %1946 = dma.hbm_to_vmem [thread:$0]  (!%p3125_p11), %s3124_s4, 2048, %s239_s6, [#allocation10], %s3127_s20, %s3127_s20, %s3126_s1  }
  0x8b   : > { %s2197_s18 = scalar_lea.hbm %s3128_s5, 2048 }
  0x8c   : > { %p2198_p6 = scmp.ne.s32.totalorder %s3128_s5, %s2197_s18  ;;  %p2204_p0 = scmp.lt.u32.totalorder %s2197_s18, %s3128_s5 }
  0x8e   : > { %p2200_p2 = pnand %p2198_p6, %p2596_p8 }
  0x90   : > { %p2201_p12 = pneg %p2200_p2 }
  0x92   : > { %p2206_p5 = pnand %p2204_p0, %p2201_p12 }
  0x94   : > { %2209 = shalt.err (!%p2206_p5)
}
  0x95   : > { %s2210_s6 = scalar_lea.vmem %s2704_s14, 2048  ;;  %p2218_p1 = scmp.lt.s32.totalorder %s2704_s14, %s2704_s14 }
  0x96   : > { %p2211_p4 = scmp.ne.s32.totalorder %s2704_s14, %s2210_s6  ;;  %p2219_p9 = scmp.lt.s32.totalorder %s2210_s6, %s2210_s6 }
  0x98   : > { %p2213_p10 = pnand %p2211_p4, %p2596_p8  ;;  %p2220_p7 = por %p2219_p9, %p2218_p1 }
  0x9a   : > { %p2214_p3 = pneg %p2213_p10 }
  0x9c   : > { %p2221_p13 = pnand %p2220_p7, %p2214_p3 }
  0x9e   : > { %2224 = shalt.err (!%p2221_p13)
}
  0x9f   : > { %1949 = dma.hbm_to_vmem [thread:$0]  (!%p3125_p11), %s3128_s5, 2048, %s2704_s14, [#allocation13], %s3127_s20, %s3127_s20, %s3126_s1  }
  0xa0   : > { %s1429_s15 = sadd.s32 4294967294, %s2447_s10   ;;  %p44_p8 = scmp.eq.s32.totalorder %s2649_s17, 0 }
  0xa1   : > { %s46_s13 = sadd.s32 1, %s2427_s29  ;;  %p53_p6 = scmp.ne.s32.totalorder %s2427_s29, %s2423_s28 }
  0xa2   : > { %s2759_s19 = scalar_select %p44_p8, %s2427_s29, %s46_s13  }
  0xa3   : > { %p3130_p2 = scmp.eq.s32.totalorder %s2447_s10, 0  ;;  %p59_p0 = scmp.ne.s32.totalorder %s2423_s28, %s2419_s27 }
  0xa4   : > { %3129 = sst [smem:[#allocation32_spill]] %s2759_s19  ;;  %p3131_p5 = scmp.eq.s32.totalorder %s2570_s11, 8 }
  0xa5   : > { %p55_p12 = por %p3130_p2, %p53_p6  ;;  %p206_p10 = scmp.eq.s32.totalorder %s1429_s15, 8 }
  0xa6   : > { %p2767_p4 = por %p3131_p5, %p53_p6  ;;  %p3133_p3 = scmp.eq.s32.totalorder %s2570_s11, 0 }
  0xa7   : > { %s265_s17 = sand.u32 1, %s2427_s29   ;;  %p2778_p11 = por %p206_p10, %p59_p0 }
  0xa8   : > { %s3132_s16 = scalar_select %p2767_p4, 1, 0 }
  0xa9   : > { %p2773_p1 = por %p3133_p3, %p59_p0  ;;  %s1435_s24 = sshll.u32 %s265_s17, 7 }
  0xaa   : > { %s3135_s14 = scalar_select %p2778_p11, 1, 0 }
  0xab   : > { %s1476_s3 = sshll.u32 %s2443_s9, 11  ;;  %s3136_s6 = sld [smem:[#allocation33_spill]] }
  0xac   : > { %s269_s23 = scalar_lea.vmem [#allocation3], %s1435_s24  ;;  %p3137_p9 = scmp.lt.s32.totalorder %s2447_s10, 9 }
  0xad   : > { %s276_s15 = sshll.u32 %s269_s23, 4  ;;  %s2796_s0 = scalar_lea.sflag [#allocation4], %s265_s17  ;;  %s2794_s15 = int_to_ptr.vmem [resolvable:$true] %s276_s15 }
  0xae   : > { %p2790_p7 = pnand %p3137_p9, %p55_p12 }
  0xb0   : > { %p2227_p8 = pneg %p2790_p7 }
  0xb1   : > { %s2786_s12 = scalar_lea.hbm %s3136_s6, %s1476_s3  ;;  %s2230_s7 = scalar_lea.hbm %s3136_s6, 6144 }
  0xb2   : > { %s2225_s21 = scalar_lea.hbm %s2786_s12, 2048  ;;  %p2231_p12 = scmp.lt.u32.totalorder %s2786_s12, %s3136_s6 }
  0xb3   : > { %p2226_p13 = scmp.ne.s32.totalorder %s2786_s12, %s2225_s21  ;;  %p2232_p0 = scmp.lt.u32.totalorder %s2230_s7, %s2225_s21 }
  0xb4   : > { %p2234_p10 = scmp.lt.u32.totalorder %s2225_s21, %s2786_s12 }
  0xb5   : > { %p2228_p6 = pnand %p2227_p8, %p2226_p13  ;;  %p2233_p5 = por %p2232_p0, %p2231_p12 }
  0xb7   : > { %p2229_p2 = pneg %p2228_p6  ;;  %p2235_p3 = por %p2234_p10, %p2233_p5 }
  0xb9   : > { %p2236_p9 = pnand %p2235_p3, %p2229_p2 }
  0xbb   : > { %2239 = shalt.err (!%p2236_p9)
}
  0xbc   : > { %s2240_s17 = scalar_lea.vmem %s2794_s15, 2048  ;;  %s2458_s24 = smov [#allocation3]  }
  0xbd   : > { %p2241_p13 = scmp.ne.s32.totalorder %s2794_s15, %s2240_s17  ;;  %s2245_s3 = sshll.u32 %s2458_s24, 4  ;;  %s2246_s3 = int_to_ptr.vmem [resolvable:$false] %s2245_s3 }
  0xbe   : > { %s2247_s22 = scalar_lea.vmem %s2246_s3, 4096  ;;  %p2248_p4 = scmp.lt.s32.totalorder %s2794_s15, %s2246_s3 }
  0xbf   : > { %p2243_p6 = pnand %p2241_p13, %p2227_p8  ;;  %p2249_p12 = scmp.lt.s32.totalorder %s2247_s22, %s2240_s17 }
  0xc1   : > { %p2244_p11 = pneg %p2243_p6  ;;  %p2250_p0 = por %p2249_p12, %p2248_p4 }
  0xc3   : > { %p2251_p5 = pnand %p2250_p0, %p2244_p11 }
  0xc5   : > { %2254 = shalt.err (!%p2251_p5)
}
  0xc6   : > { %s3139_s21 = sld [smem:[#allocation23_spill]]  ;;  %s3140_s7 = sld [smem:[#allocation22_spill]] }
  0xc7   : > { %s3141_s23 = sld [smem:[#allocation21_spill]]  ;;  %p3142_p11 = scmp.eq.s32.totalorder %s2626_s30, 0 }
  0xc8   : > { %1953 = dma.hbm_to_vmem [thread:$0]  (!%p2790_p7), %s2786_s12, 2048, %s2794_s15, %s2796_s0, %s3127_s20, %s3127_s20, %s3126_s1  }
  0xc9   : > { %p3143_p8 = scmp.eq.s32.totalorder %s2447_s10, 0  ;;  %s1477_s3 = sshll.u32 %s2439_s8, 10 }
  0xca   : > { %p3144_p3 = scmp.eq.s32.totalorder %s2570_s11, 0  ;;  %s3146_s9 = sld [smem:[#allocation35_spill]] }
  0xcb   : > { %p3148_p7 = scmp.lt.s32.totalorder %s2447_s10, 9 }
  0xcc   : > { %s100_s13 = sadd.s32 1, %s3139_s21  ;;  %p107_p4 = scmp.ne.s32.totalorder %s3139_s21, %s3140_s7 }
  0xcd   : > { %s2833_s17 = scalar_select %p3142_p11, %s3139_s21, %s100_s13  }
  0xce   : > { %p109_p2 = por %p107_p4, %p3143_p8  ;;  %p113_p10 = scmp.ne.s32.totalorder %s3140_s7, %s3141_s23 }
  0xcf   : > { %s311_s24 = sand.u32 1, %s3139_s21  }
  0xd0   : > { %p2843_p9 = por %p113_p10, %p3144_p3  ;;  %s1442_s4 = sshll.u32 %s311_s24, 6 }
  0xd1   : > { %s3147_s19 = smov %s3146_s9  ;;  %s2850_s0 = scalar_lea.hbm %s3146_s9, %s1477_s3 }
  0xd2   : > { %s3145_s22 = scalar_select %p2843_p9, 1, 0 }
  0xd3   : > { %s313_s30 = scalar_lea.vmem [#allocation8], %s1442_s4  ;;  %p2854_p13 = pnand %p3148_p7, %p109_p2 }
  0xd4   : > { %s320_s1 = sshll.u32 %s313_s30, 4  ;;  %s2255_s12 = scalar_lea.hbm %s2850_s0, 1024  ;;  %s2858_s1 = int_to_ptr.vmem [resolvable:$true] %s320_s1 }
  0xd5   : > { %p2256_p6 = scmp.ne.s32.totalorder %s2850_s0, %s2255_s12  ;;  %p2257_p12 = pneg %p2854_p13 }
  0xd6   : > { %s2260_s9 = scalar_lea.hbm %s3147_s19, 3072  ;;  %p2261_p4 = scmp.lt.u32.totalorder %s2850_s0, %s3147_s19 }
  0xd7   : > { %p2258_p0 = pnand %p2257_p12, %p2256_p6  ;;  %p2262_p11 = scmp.lt.u32.totalorder %s2260_s9, %s2255_s12 }
  0xd8   : > { %p2264_p2 = scmp.lt.u32.totalorder %s2255_s12, %s2850_s0 }
  0xd9   : > { %p2259_p5 = pneg %p2258_p0  ;;  %p2263_p8 = por %p2262_p11, %p2261_p4 }
  0xdb   : > { %p2265_p10 = por %p2264_p2, %p2263_p8 }
  0xdd   : > { %p2266_p3 = pnand %p2265_p10, %p2259_p5 }
  0xdf   : > { %2269 = shalt.err (!%p2266_p3)
}
  0xe0   : > { %s2270_s21 = scalar_lea.vmem %s2858_s1, 1024  ;;  %s2459_s7 = smov [#allocation8]  }
  0xe1   : > { %p2271_p7 = scmp.ne.s32.totalorder %s2858_s1, %s2270_s21  ;;  %s2275_s23 = sshll.u32 %s2459_s7, 4  ;;  %s2276_s23 = int_to_ptr.vmem [resolvable:$false] %s2275_s23 }
  0xe2   : > { %s2277_s13 = scalar_lea.vmem %s2276_s23, 2048  ;;  %p2278_p9 = scmp.lt.s32.totalorder %s2858_s1, %s2276_s23 }
  0xe3   : > { %p2273_p6 = pnand %p2271_p7, %p2257_p12  ;;  %p2279_p4 = scmp.lt.s32.totalorder %s2277_s13, %s2270_s21 }
  0xe5   : > { %p2274_p0 = pneg %p2273_p6  ;;  %p2280_p11 = por %p2279_p4, %p2278_p9 }
  0xe7   : > { %p2281_p8 = pnand %p2280_p11, %p2274_p0 }
  0xe9   : > { %2284 = shalt.err (!%p2281_p8)
}
  0xea   : > { %s3150_s24 = smov 4   ;;  %s3151_s3 = smov 64  }
  0xeb   : > { %1959 = dma.hbm_to_vmem [thread:$0]  (!%p2854_p13), %s2850_s0, 1024, %s2858_s1, %s2674_s2, %s3151_s3, %s3151_s3, %s3150_s24  }
  0xec   : > { %s3152_s30 = sld [smem:[#allocation28_spill]] }
  0xf2   : > { %p3153_p12 = scmp.ne.s32.totalorder %s3152_s30, 0 }
  0xf3   : > { %s2892_s12 = sand.u32 (!%p3153_p12), 1, %s2423_s28  }
  0xf4   : > { %332 = sbr.rel (%p3153_p12) target bundleno = 1073 (0x431), region = 44  ;;  %s1446_s5 = sshll.u32 (!%p3153_p12), %s2892_s12, 7 }
  0xf5   : > { %s335_s4 = scalar_lea.sflag (!%p3153_p12), [#allocation4], %s2892_s12  ;;  %s2896_s9 = scalar_lea.vmem (!%p3153_p12), [#allocation3], %s1446_s5 }
  0xfb   : > { %2370 = dma.done.wait (%p2773_p1), %s335_s4, 2048  }
  0xfc   : > { %2372 = vsyncadd (%p2773_p1), %s335_s4, 4294965248  ;;  %s3154_s2 = sld [smem:[#allocation24_spill]]  ;;  %s3155_s0 = sld [smem:[#allocation31_spill]] }
  0xfd   : > { %s343_s1 = sand.u32 1, %s2570_s11  }
  0xfe   : > { %s344_s15 = scalar_lea.sflag [#allocation7], %s343_s1 }
 0x102   : > { %s345_s20 = sand.u32 1, %s3154_s2   ;;  %p3156_p9 = scmp.ne.s32.totalorder %s3155_s0, 0 }
 0x103   : > { %s1447_s6 = sshll.u32 %s345_s20, 6 }
 0x104   : > { %s2904_s21 = scalar_lea.vmem [#allocation6], %s1447_s6 }
 0x105   : > { %2374 = dma.done.wait (%p3156_p9), %s344_s15, 1024  }
 0x106   : > { %2376 = vsyncadd (%p3156_p9), %s344_s15, 4294966272  ;;  %s3157_s7 = sld [smem:[#allocation22_spill]]  ;;  %p3158_p1 = scmp.ne.s32.totalorder %s3145_s22, 0 }
 0x10c   : > { %s354_s23 = sand.u32 1, %s3157_s7  }
 0x10d   : > { %s1448_s13 = sshll.u32 %s354_s23, 6 }
 0x10e   : > { %s2911_s18 = scalar_lea.vmem [#allocation8], %s1448_s13 }
 0x10f   : > { %2378 = dma.done.wait (%p3158_p1), %s344_s15, 1024  }
 0x110   : > { %2380 = vsyncadd (%p3158_p1), %s344_s15, 4294966272  ;;  %p3159_p13 = scmp.eq.s32.totalorder %s2570_s11, 0 }
 0x112   : > { %2382 = dma.done.wait (%p3159_p13), [#allocation10], 4096   ;;  %p3160_p5 = pmov %p3159_p13 }
 0x114   : > { %2384 = vsyncadd (%p3160_p5), [#allocation10], 4294963200  ;;  %p3161_p2 = pmov %p3160_p5 }
 0x116   : > { %2386 = dma.done.wait (%p3161_p2), [#allocation13], 2048   ;;  %p3162_p10 = pmov %p3161_p2 }
 0x117   : > { %s2925_s24 = scalar_lea.vmem [#allocation14], %s1446_s5  ;;  %s3163_s3 = sld [smem:[#allocation25_spill]] }
 0x118   : > { %2388 = vsyncadd (%p3162_p10), [#allocation13], 4294965248 }
 0x11d   : > { %p1453_p3 = scmp.ne.s32.totalorder %s3163_s3, 0 }
 0x11e   : > { %v2460_v0 = vmov (!%p1453_p3), 0.0  }
 0x11f   : > { %415 = sbr.rel (%p1453_p3) target bundleno = 295 (0x127), region = 72  ;;  %416 = vst [vmem:[#allocation2] sm:$0xff] (!%p1453_p3), %v2460_v0  ;;  %417 = vst [vmem:[#allocation2 + $0x8] sm:$0xff] (!%p1453_p3), %v2460_v0 }
 0x120   : > { %418 = vst [vmem:[#allocation2 + $0x10] sm:$0xff] (!%p1453_p3), %v2460_v0  ;;  %419 = vst [vmem:[#allocation2 + $0x18] sm:$0xff] (!%p1453_p3), %v2460_v0 }
 0x121   : > { %420 = vst [vmem:[#allocation2 + $0x20] sm:$0xff] (!%p1453_p3), %v2460_v0  ;;  %421 = vst [vmem:[#allocation2 + $0x28] sm:$0xff] (!%p1453_p3), %v2460_v0 }
 0x122   : > { %422 = vst [vmem:[#allocation2 + $0x30] sm:$0xff] (!%p1453_p3), %v2460_v0  ;;  %423 = vst [vmem:[#allocation2 + $0x38] sm:$0xff] (!%p1453_p3), %v2460_v0 }
 0x123   : > { %424 = vst [vmem:[#allocation2 + $0x40] sm:$0xff] (!%p1453_p3), %v2460_v0  ;;  %425 = vst [vmem:[#allocation2 + $0x48] sm:$0xff] (!%p1453_p3), %v2460_v0 }
 0x124   : > { %426 = vst [vmem:[#allocation2 + $0x50] sm:$0xff] (!%p1453_p3), %v2460_v0  ;;  %427 = vst [vmem:[#allocation2 + $0x58] sm:$0xff] (!%p1453_p3), %v2460_v0 }
 0x125   : > { %428 = vst [vmem:[#allocation2 + $0x60] sm:$0xff] (!%p1453_p3), %v2460_v0  ;;  %429 = vst [vmem:[#allocation2 + $0x68] sm:$0xff] (!%p1453_p3), %v2460_v0 }
 0x126   : > { %430 = vst [vmem:[#allocation2 + $0x70] sm:$0xff] %v2460_v0  ;;  %431 = vst [vmem:[#allocation2 + $0x78] sm:$0xff] %v2460_v0 }
 0x127 PF: > { %v2095_v1 = vld [vmem:[%s2911_s18] sm:$0xff]   ;;  %v2096_v2 = vld [vmem:[%s2911_s18 + $0x8] sm:$0xff]   ;;  %v2097_v3 = vld [vmem:[%s2911_s18 + $0x10] sm:$0xff]   ;;  %s3164_s11 = sld [smem:[#allocation25_spill]] }
 0x128   : > { %1591 = vmatprep.subr.bf16.mxu0 %v2095_v1  ;;  %1887 = vmatprep.subr.bf16.mxu1 %v2095_v1  ;;  %v2098_v4 = vld [vmem:[%s2911_s18 + $0x18] sm:$0xff]   ;;  %v2103_v5 = vld [vmem:[%s2904_s21] sm:$0xff]   ;;  %v2100_v8 = vld [vmem:[%s2911_s18 + $0x28] sm:$0xff]  }
 0x129   : > { %1592 = vmatpush3.bf16.msra.mxu0 %v2095_v1  ;;  %1895 = vmatpush3.bf16.msra.mxu1 %v2095_v1  ;;  %v2104_v6 = vld [vmem:[%s2904_s21 + $0x20] sm:$0xff]   ;;  %v2101_v9 = vld [vmem:[%s2911_s18 + $0x30] sm:$0xff]   ;;  %v2102_v10 = vld [vmem:[%s2911_s18 + $0x38] sm:$0xff]  }
 0x12a   : > { %1593 = vmatprep.subr.bf16.mxu0 %v2096_v2  ;;  %1888 = vmatprep.subr.bf16.mxu1 %v2096_v2  ;;  %v2099_v7 = vld [vmem:[%s2911_s18 + $0x20] sm:$0xff]   ;;  %v2105_v11 = vld [vmem:[%s2904_s21 + $0x8] sm:$0xff]   ;;  %v2107_v13 = vld [vmem:[%s2904_s21 + $0x10] sm:$0xff]  }
 0x12b   : > { %1607 = vmatprep.mubr.bf16.mxu0 %v2103_v5  ;;  %1615 = vmatprep.mubr.bf16.mxu1 %v2104_v6  ;;  %v2106_v12 = vld [vmem:[%s2904_s21 + $0x28] sm:$0xff]   ;;  %v2108_v14 = vld [vmem:[%s2904_s21 + $0x30] sm:$0xff]   ;;  %v2109_v15 = vld [vmem:[%s2904_s21 + $0x18] sm:$0xff]  }
 0x12c   : > { %v2110_v16 = vld [vmem:[%s2904_s21 + $0x38] sm:$0xff]   ;;  %v434_v17 = vld [vmem:[#allocation2 + $0x10] sm:$0xff]  ;;  %v432_v19 = vld [vmem:[#allocation2] sm:$0xff] }
 0x12d   : > { %1594 = vmatpush3.bf16.msra.mxu0 %v2096_v2  ;;  %1896 = vmatpush3.bf16.msra.mxu1 %v2096_v2  ;;  %v442_v18 = vld [vmem:[#allocation2 + $0x50] sm:$0xff]  ;;  %v440_v20 = vld [vmem:[#allocation2 + $0x40] sm:$0xff]  ;;  %v435_v23 = vld [vmem:[#allocation2 + $0x18] sm:$0xff]  ;;  %p1470_p7 = scmp.ne.s32.totalorder %s3164_s11, 2 }
 0x12e   : > { %1595 = vmatprep.subr.bf16.mxu0 %v2097_v3  ;;  %1889 = vmatprep.subr.bf16.mxu1 %v2097_v3  ;;  %v443_v24 = vld [vmem:[#allocation2 + $0x58] sm:$0xff]  ;;  %v433_v29 = vld [vmem:[#allocation2 + $0x8] sm:$0xff]  ;;  %v438_v41 = vld [vmem:[#allocation2 + $0x30] sm:$0xff] }
 0x12f   : > { %v441_v30 = vld [vmem:[#allocation2 + $0x48] sm:$0xff]  ;;  %v446_v42 = vld [vmem:[#allocation2 + $0x70] sm:$0xff]  ;;  %v436_v43 = vld [vmem:[#allocation2 + $0x20] sm:$0xff] }
 0x130   : > { %v444_v44 = vld [vmem:[#allocation2 + $0x60] sm:$0xff]  ;;  %v439_v47 = vld [vmem:[#allocation2 + $0x38] sm:$0xff]  ;;  %v437_v53 = vld [vmem:[#allocation2 + $0x28] sm:$0xff] }
 0x131   : > { %1596 = vmatpush3.bf16.msra.mxu0 %v2097_v3  ;;  %1897 = vmatpush3.bf16.msra.mxu1 %v2097_v3  ;;  %v447_v48 = vld [vmem:[#allocation2 + $0x78] sm:$0xff]  ;;  %v445_v54 = vld [vmem:[#allocation2 + $0x68] sm:$0xff]  ;;  %v757_v1 = vld [vmem:[#allocation11] sm:$0xff] (!%p1470_p7) }
 0x132   : > { %1597 = vmatprep.subr.bf16.mxu0 %v2098_v4  ;;  %1890 = vmatprep.subr.bf16.mxu1 %v2098_v4  ;;  %v758_v2 = vld [vmem:[#allocation11 + $0x8] sm:$0xff] (!%p1470_p7)  ;;  %v759_v3 = vld [vmem:[#allocation11 + $0x10] sm:$0xff] (!%p1470_p7)  ;;  %v760_v5 = vld [vmem:[#allocation11 + $0x18] sm:$0xff] (!%p1470_p7) }
 0x133   : > { %v1795_v6 = vpack.c.bf16 (!%p1470_p7), %v760_v5, %v759_v3 }
 0x135   : > { %1598 = vmatpush3.bf16.msra.mxu0 %v2098_v4  ;;  %1898 = vmatpush3.bf16.msra.mxu1 %v2098_v4  ;;  %v1791_v4 = vpack.c.bf16 (!%p1470_p7), %v758_v2, %v757_v1  ;;  %v734_v1 = vld [vmem:[#allocation9 + $0x48] sm:$0xff] (!%p1470_p7) }
 0x136   : > { %1599 = vmatprep.subr.bf16.mxu0 %v2099_v7  ;;  %1891 = vmatprep.subr.bf16.mxu1 %v2099_v7 }
 0x139   : > { %1600 = vmatpush3.bf16.msra.mxu0 %v2099_v7  ;;  %1899 = vmatpush3.bf16.msra.mxu1 %v2099_v7  ;;  %v761_v7 = vld [vmem:[#allocation11 + $0x20] sm:$0xff] (!%p1470_p7) }
 0x13a   : > { %1601 = vmatprep.subr.bf16.mxu0 %v2100_v8  ;;  %1892 = vmatprep.subr.bf16.mxu1 %v2100_v8 }
 0x13d   : > { %1602 = vmatpush3.bf16.msra.mxu0 %v2100_v8  ;;  %1900 = vmatpush3.bf16.msra.mxu1 %v2100_v8  ;;  %v762_v8 = vld [vmem:[#allocation11 + $0x28] sm:$0xff] (!%p1470_p7) }
 0x13e   : > { %1603 = vmatprep.subr.bf16.mxu0 %v2101_v9  ;;  %1893 = vmatprep.subr.bf16.mxu1 %v2101_v9 }
 0x141   : > { %1604 = vmatpush3.bf16.msra.mxu0 %v2101_v9  ;;  %1901 = vmatpush3.bf16.msra.mxu1 %v2101_v9  ;;  %v1799_v9 = vpack.c.bf16 (!%p1470_p7), %v762_v8, %v761_v7  ;;  %v736_v7 = vld [vmem:[#allocation9 + $0x58] sm:$0xff] (!%p1470_p7) }
 0x142   : > { %1605 = vmatprep.subr.bf16.mxu0 %v2102_v10  ;;  %1894 = vmatprep.subr.bf16.mxu1 %v2102_v10 }
 0x145   : > { %1606 = vmatpush3.bf16.msra.mxu0 %v2102_v10  ;;  %1902 = vmatpush3.bf16.msra.mxu1 %v2102_v10 }
 0x146   : > { %1792 = vmatprep.subr.bf16.mxu0 (!%p1470_p7), %v1791_v4 }
 0x148   : > { %1608 = vmatmul.mubr.bf16.vlgmr.msra.gmra.mrb[0].mxu0 %v2105_v11  ;;  %1616 = vmatmul.mubr.bf16.vlgmr.msra.gmra.mrb[0].mxu1 %v2106_v12  ;;  %v763_v11 = vld [vmem:[#allocation11 + $0x30] sm:$0xff] (!%p1470_p7)  ;;  %v764_v12 = vld [vmem:[#allocation11 + $0x38] sm:$0xff] (!%p1470_p7) }
 0x149   : > { %1611 = vmatprep.mubr.bf16.mxu0 %v2107_v13  ;;  %1619 = vmatprep.mubr.bf16.mxu1 %v2108_v14  ;;  %v1803_v13 = vpack.c.bf16 (!%p1470_p7), %v764_v12, %v763_v11  ;;  %v765_v14 = vld [vmem:[#allocation11 + $0x40] sm:$0xff] (!%p1470_p7)  ;;  %v738_v12 = vld [vmem:[#allocation9 + $0x68] sm:$0xff] (!%p1470_p7) }
 0x14a   : > { %1794 = vmatpush3.bf16.msra.mxu0 (!%p1470_p7), %v1791_v4  ;;  %v737_v11 = vld [vmem:[#allocation9 + $0x60] sm:$0xff] (!%p1470_p7) }
 0x14b   : > { %1796 = vmatprep.subr.bf16.mxu0 (!%p1470_p7), %v1795_v6 }
 0x14e   : > { %1798 = vmatpush3.bf16.msra.mxu0 (!%p1470_p7), %v1795_v6  ;;  %v735_v6 = vld [vmem:[#allocation9 + $0x50] sm:$0xff] (!%p1470_p7) }
 0x14f   : > { %1800 = vmatprep.subr.bf16.mxu0 (!%p1470_p7), %v1799_v9 }
 0x150   : > { %1612 = vmatmul.mubr.bf16.gmra.mrb[4].mxu0 %v2109_v15  ;;  %1620 = vmatmul.mubr.bf16.gmra.mrb[4].mxu1 %v2110_v16  ;;  %v766_v15 = vld [vmem:[#allocation11 + $0x48] sm:$0xff] (!%p1470_p7) }
 0x151   : > { %v1807_v16 = vpack.c.bf16 (!%p1470_p7), %v766_v15, %v765_v14  ;;  %v1847_v15 = vpack.c.bf16 (!%p1470_p7), %v738_v12, %v737_v11 }
 0x152   : > { %1802 = vmatpush3.bf16.msra.mxu0 (!%p1470_p7), %v1799_v9 }
 0x153   : > { %1804 = vmatprep.subr.bf16.mxu0 (!%p1470_p7), %v1803_v13 }
 0x156   : > { %1806 = vmatpush3.bf16.msra.mxu0 (!%p1470_p7), %v1803_v13 }
 0x157   : > { %1808 = vmatprep.subr.bf16.mxu0 (!%p1470_p7), %v1807_v16 }
 0x15a   : > { %1810 = vmatpush3.bf16.msra.mxu0 (!%p1470_p7), %v1807_v16  ;;  %v739_v16 = vld [vmem:[#allocation9 + $0x70] sm:$0xff] (!%p1470_p7) }
 0x21b   : > { %v1609_v21 = vpop.f32.mrb[0].mxu0  ;;  %v1617_v22 = vpop.f32.mrb[0].mxu1 }
 0x21c   : > { %v675_v25 = vadd.f32 %v1609_v21, %v434_v17  ;;  %v683_v26 = vadd.f32 %v1617_v22, %v442_v18  ;;  %v610_v27 = vpop.f32.mrb[1].mxu0  ;;  %v642_v28 = vpop.f32.mrb[1].mxu1  ;;  %v767_v17 = vld [vmem:[#allocation11 + $0x50] sm:$0xff] (!%p1470_p7)  ;;  %v768_v18 = vld [vmem:[#allocation11 + $0x58] sm:$0xff] (!%p1470_p7)  ;;  %v770_v21 = vld [vmem:[#allocation11 + $0x68] sm:$0xff] (!%p1470_p7) }
 0x21d   : > { %v673_v31 = vadd.f32 %v610_v27, %v432_v19  ;;  %v681_v32 = vadd.f32 %v642_v28, %v440_v20  ;;  %v1610_v33 = vpop.f32.mrb[2].mxu0  ;;  %v1618_v34 = vpop.f32.mrb[2].mxu1  ;;  %v1811_v19 = vpack.c.bf16 (!%p1470_p7), %v768_v18, %v767_v17  ;;  %v769_v20 = vld [vmem:[#allocation11 + $0x60] sm:$0xff] (!%p1470_p7)  ;;  %v1081_v28 = vld [vmem:[#allocation12 + $0x10] sm:$0xff] (!%p1470_p7)  ;;  %v740_v17 = vld [vmem:[#allocation9 + $0x78] sm:$0xff] (!%p1470_p7) }
 0x21e   : > { %691 = vst [vmem:[#allocation2 + $0x10] sm:$0xff] %v675_v25  ;;  %699 = vst [vmem:[#allocation2 + $0x50] sm:$0xff] %v683_v26  ;;  %v676_v35 = vadd.f32 %v1610_v33, %v435_v23  ;;  %v684_v36 = vadd.f32 %v1618_v34, %v443_v24  ;;  %v613_v37 = vpop.f32.mrb[3].mxu0  ;;  %v645_v38 = vpop.f32.mrb[3].mxu1  ;;  %v1815_v22 = vpack.c.bf16 (!%p1470_p7), %v770_v21, %v769_v20  ;;  %v771_v23 = vld [vmem:[#allocation11 + $0x70] sm:$0xff] (!%p1470_p7)  ;;  %v1079_v24 = vld [vmem:[#allocation12] sm:$0xff] (!%p1470_p7) }
 0x21f   : > { %689 = vst [vmem:[#allocation2] sm:$0xff] %v673_v31  ;;  %697 = vst [vmem:[#allocation2 + $0x40] sm:$0xff] %v681_v32  ;;  %v674_v39 = vadd.f32 %v613_v37, %v433_v29  ;;  %v682_v40 = vadd.f32 %v645_v38, %v441_v30  ;;  %1812 = vmatprep.subr.bf16.mxu0 (!%p1470_p7), %v1811_v19  ;;  %v1080_v25 = vld [vmem:[#allocation12 + $0x8] sm:$0xff] (!%p1470_p7)  ;;  %v772_v26 = vld [vmem:[#allocation11 + $0x78] sm:$0xff] (!%p1470_p7)  ;;  %v1851_v20 = vpack.c.bf16 (!%p1470_p7), %v740_v17, %v739_v16 }
 0x220   : > { %692 = vst [vmem:[#allocation2 + $0x18] sm:$0xff] %v676_v35  ;;  %700 = vst [vmem:[#allocation2 + $0x58] sm:$0xff] %v684_v36  ;;  %v1855_v27 = vpack.c.bf16 (!%p1470_p7), %v1080_v25, %v1079_v24  ;;  %v1082_v29 = vld [vmem:[#allocation12 + $0x18] sm:$0xff] (!%p1470_p7)  ;;  %v1083_v31 = vld [vmem:[#allocation12 + $0x20] sm:$0xff] (!%p1470_p7)  ;;  %1814 = vmatpush3.bf16.msra.mxu0 (!%p1470_p7), %v1811_v19  ;;  %v1819_v33 = vpack.c.bf16 (!%p1470_p7), %v772_v26, %v771_v23 }
 0x221   : > { %690 = vst [vmem:[#allocation2 + $0x8] sm:$0xff] %v674_v39  ;;  %698 = vst [vmem:[#allocation2 + $0x48] sm:$0xff] %v682_v40  ;;  %v1859_v30 = vpack.c.bf16 (!%p1470_p7), %v1082_v29, %v1081_v28  ;;  %v1084_v32 = vld [vmem:[#allocation12 + $0x28] sm:$0xff] (!%p1470_p7)  ;;  %1816 = vmatprep.subr.bf16.mxu0 (!%p1470_p7), %v1815_v22  ;;  %v725_v34 = vld [vmem:[#allocation9] sm:$0xff] (!%p1470_p7) }
 0x222   : > { %1856 = vmatprep.subr.bf16.mxu1 (!%p1470_p7), %v1855_v27  ;;  %v726_v35 = vld [vmem:[#allocation9 + $0x8] sm:$0xff] (!%p1470_p7)  ;;  %v1863_v36 = vpack.c.bf16 (!%p1470_p7), %v1084_v32, %v1083_v31  ;;  %v1085_v37 = vld [vmem:[#allocation12 + $0x30] sm:$0xff] (!%p1470_p7)  ;;  %v1086_v38 = vld [vmem:[#allocation12 + $0x38] sm:$0xff] (!%p1470_p7) }
 0x223   : > { %v1613_v45 = vpop.f32.mrb[4].mxu0  ;;  %v1621_v46 = vpop.f32.mrb[4].mxu1  ;;  %708 = sbr.rel (%p1470_p7) target bundleno = 1045 (0x415), region = 76  ;;  %1858 = vmatpush3.bf16.msra.mxu1 (!%p1470_p7), %v1855_v27  ;;  %v1823_v39 = vpack.c.bf16 (!%p1470_p7), %v726_v35, %v725_v34  ;;  %v727_v40 = vld [vmem:[#allocation9 + $0x10] sm:$0xff] (!%p1470_p7)  ;;  %v710_v23 = vld [vmem:[%s2896_s9 + $0x8] sm:$0xff] (!%p1470_p7)  ;;  %v712_v25 = vld [vmem:[%s2896_s9 + $0x18] sm:$0xff] (!%p1470_p7) }
 0x224   : > { %v679_v49 = vadd.f32 %v1613_v45, %v438_v41  ;;  %v687_v50 = vadd.f32 %v1621_v46, %v446_v42  ;;  %v626_v51 = vpop.f32.mrb[5].mxu0  ;;  %v658_v52 = vpop.f32.mrb[5].mxu1  ;;  %1860 = vmatprep.subr.bf16.mxu1 (!%p1470_p7), %v1859_v30  ;;  %1818 = vmatpush3.bf16.msra.mxu0 (!%p1470_p7), %v1815_v22  ;;  %v728_v41 = vld [vmem:[#allocation9 + $0x18] sm:$0xff] (!%p1470_p7)  ;;  %v1867_v42 = vpack.c.bf16 (!%p1470_p7), %v1086_v38, %v1085_v37  ;;  %v709_v22 = vld [vmem:[%s2896_s9] sm:$0xff] (!%p1470_p7)  ;;  %v711_v24 = vld [vmem:[%s2896_s9 + $0x10] sm:$0xff] (!%p1470_p7) }
 0x225   : > { %v677_v55 = vadd.f32 %v626_v51, %v436_v43  ;;  %v685_v56 = vadd.f32 %v658_v52, %v444_v44  ;;  %v1614_v57 = vpop.f32.mrb[6].mxu0  ;;  %v1622_v58 = vpop.f32.mrb[6].mxu1  ;;  %1820 = vmatprep.subr.bf16.mxu0 (!%p1470_p7), %v1819_v33  ;;  %v1087_v43 = vld [vmem:[#allocation12 + $0x40] sm:$0xff] (!%p1470_p7)  ;;  %v1088_v44 = vld [vmem:[#allocation12 + $0x48] sm:$0xff] (!%p1470_p7)  ;;  %v743_v46 = vld [vmem:[#allocation2 + $0x10] sm:$0xff] (!%p1470_p7) }
 0x226   : > { %695 = vst [vmem:[#allocation2 + $0x30] sm:$0xff] %v679_v49  ;;  %703 = vst [vmem:[#allocation2 + $0x70] sm:$0xff] %v687_v50  ;;  %v680_v59 = vadd.f32 %v1614_v57, %v439_v47  ;;  %v688_v60 = vadd.f32 %v1622_v58, %v447_v48  ;;  %v629_v61 = vpop.f32.mrb[7].mxu0  ;;  %v661_v62 = vpop.f32.mrb[7].mxu1  ;;  %v741_v10 = vld [vmem:[#allocation2] sm:$0xff] (!%p1470_p7)  ;;  %v1827_v47 = vpack.c.bf16 (!%p1470_p7), %v728_v41, %v727_v40  ;;  %v730_v49 = vld [vmem:[#allocation9 + $0x28] sm:$0xff] (!%p1470_p7) }
 0x227   : > { %693 = vst [vmem:[#allocation2 + $0x20] sm:$0xff] %v677_v55  ;;  %701 = vst [vmem:[#allocation2 + $0x60] sm:$0xff] %v685_v56  ;;  %v678_v63 = vadd.f32 %v629_v61, %v437_v53  ;;  %v686_v0 = vadd.f32 %v661_v62, %v445_v54  ;;  %1655 = vmatprep.mubr.f32.mxu0 (!%p1470_p7), %v741_v10  ;;  %1862 = vmatpush3.bf16.msra.mxu1 (!%p1470_p7), %v1859_v30  ;;  %v729_v48 = vld [vmem:[#allocation9 + $0x20] sm:$0xff] (!%p1470_p7)  ;;  %v1089_v51 = vld [vmem:[#allocation12 + $0x50] sm:$0xff] (!%p1470_p7) }
 0x228   : > { %696 = vst [vmem:[#allocation2 + $0x38] sm:$0xff] %v680_v59  ;;  %704 = vst [vmem:[#allocation2 + $0x78] sm:$0xff] %v688_v60  ;;  %1864 = vmatprep.subr.bf16.mxu1 (!%p1470_p7), %v1863_v36  ;;  %1822 = vmatpush3.bf16.msra.mxu0 (!%p1470_p7), %v1819_v33  ;;  %v742_v45 = vld [vmem:[#allocation2 + $0x8] sm:$0xff] (!%p1470_p7)  ;;  %v1871_v50 = vpack.c.bf16 (!%p1470_p7), %v1088_v44, %v1087_v43  ;;  %v1090_v52 = vld [vmem:[#allocation12 + $0x58] sm:$0xff] (!%p1470_p7)  ;;  %v1831_v55 = vpack.c.bf16 (!%p1470_p7), %v730_v49, %v729_v48 }
 0x229   : > { %694 = vst [vmem:[#allocation2 + $0x28] sm:$0xff] %v678_v63  ;;  %702 = vst [vmem:[#allocation2 + $0x68] sm:$0xff] %v686_v0  ;;  %1824 = vmatprep.subr.bf16.mxu0 (!%p1470_p7), %v1823_v39  ;;  %v744_v53 = vld [vmem:[#allocation2 + $0x18] sm:$0xff] (!%p1470_p7)  ;;  %v731_v56 = vld [vmem:[#allocation9 + $0x30] sm:$0xff] (!%p1470_p7)  ;;  %v1875_v58 = vpack.c.bf16 (!%p1470_p7), %v1090_v52, %v1089_v51  ;;  %v1843_v10 = vpack.c.bf16 (!%p1470_p7), %v736_v7, %v735_v6 }
 0x22a   : > { %v732_v57 = vld [vmem:[#allocation9 + $0x38] sm:$0xff]  ;;  %v1091_v59 = vld [vmem:[#allocation12 + $0x60] sm:$0xff]  ;;  %v1092_v60 = vld [vmem:[#allocation12 + $0x68] sm:$0xff] }
 0x22b   : > { %1866 = vmatpush3.bf16.msra.mxu1 %v1863_v36  ;;  %1656 = vmatmul.mubr.f32.vlgmr.msra.gmra.mrb[0].mxu0 %v742_v45  ;;  %v1835_v63 = vpack.c.bf16 %v732_v57, %v731_v56  ;;  %v733_v0 = vld [vmem:[#allocation9 + $0x40] sm:$0xff]  ;;  %v1879_v2 = vpack.c.bf16 %v1092_v60, %v1091_v59  ;;  %v750_v8 = vld [vmem:[#allocation2 + $0x48] sm:$0xff]  ;;  %v751_v9 = vld [vmem:[#allocation2 + $0x50] sm:$0xff] }
 0x22c   : > { %1868 = vmatprep.subr.bf16.mxu1 %v1867_v42  ;;  %1826 = vmatpush3.bf16.msra.mxu0 %v1823_v39  ;;  %v749_v4 = vld [vmem:[#allocation2 + $0x40] sm:$0xff]  ;;  %v1839_v5 = vpack.c.bf16 %v734_v1, %v733_v0  ;;  %v752_v13 = vld [vmem:[#allocation2 + $0x58] sm:$0xff]  ;;  %v714_v27 = vld [vmem:[%s2896_s9 + $0x28] sm:$0xff] }
 0x22d   : > { %1658 = vmatprep.mubr.f32.mxu0 %v743_v46  ;;  %1828 = vmatprep.subr.bf16.mxu0 %v1827_v47  ;;  %v747_v62 = vld [vmem:[#allocation2 + $0x30] sm:$0xff]  ;;  %v713_v26 = vld [vmem:[%s2896_s9 + $0x20] sm:$0xff]  ;;  %v716_v29 = vld [vmem:[%s2896_s9 + $0x38] sm:$0xff] }
 0x22e   : > { %v745_v54 = vld [vmem:[#allocation2 + $0x20] sm:$0xff]  ;;  %v755_v19 = vld [vmem:[#allocation2 + $0x70] sm:$0xff]  ;;  %v718_v31 = vld [vmem:[%s2896_s9 + $0x48] sm:$0xff] }
 0x22f   : > { %1870 = vmatpush3.bf16.msra.mxu1 %v1867_v42  ;;  %1659 = vmatmul.mubr.f32.gmra.mrb[2].mxu0 %v744_v53  ;;  %v748_v3 = vld [vmem:[#allocation2 + $0x38] sm:$0xff]  ;;  %v753_v14 = vld [vmem:[#allocation2 + $0x60] sm:$0xff]  ;;  %v715_v28 = vld [vmem:[%s2896_s9 + $0x30] sm:$0xff] }
 0x230   : > { %1872 = vmatprep.subr.bf16.mxu1 %v1871_v50  ;;  %1830 = vmatpush3.bf16.msra.mxu0 %v1827_v47  ;;  %v746_v61 = vld [vmem:[#allocation2 + $0x28] sm:$0xff]  ;;  %v756_v21 = vld [vmem:[#allocation2 + $0x78] sm:$0xff]  ;;  %v717_v30 = vld [vmem:[%s2896_s9 + $0x40] sm:$0xff] }
 0x231   : > { %1661 = vmatprep.mubr.f32.mxu0 %v745_v54  ;;  %1832 = vmatprep.subr.bf16.mxu0 %v1831_v55  ;;  %v754_v18 = vld [vmem:[#allocation2 + $0x68] sm:$0xff]  ;;  %v719_v32 = vld [vmem:[%s2896_s9 + $0x50] sm:$0xff]  ;;  %v720_v33 = vld [vmem:[%s2896_s9 + $0x58] sm:$0xff] }
 0x232   : > { %v721_v34 = vld [vmem:[%s2896_s9 + $0x60] sm:$0xff]  ;;  %v722_v35 = vld [vmem:[%s2896_s9 + $0x68] sm:$0xff]  ;;  %v723_v36 = vld [vmem:[%s2896_s9 + $0x70] sm:$0xff] }
 0x233   : > { %1874 = vmatpush3.bf16.msra.mxu1 %v1871_v50  ;;  %1662 = vmatmul.mubr.f32.gmra.mrb[4].mxu0 %v746_v61  ;;  %v724_v37 = vld [vmem:[%s2896_s9 + $0x78] sm:$0xff]  ;;  %v1093_v38 = vld [vmem:[#allocation12 + $0x70] sm:$0xff] }
 0x234   : > { %1876 = vmatprep.subr.bf16.mxu1 %v1875_v58  ;;  %1834 = vmatpush3.bf16.msra.mxu0 %v1831_v55  ;;  %v1094_v39 = vld [vmem:[#allocation12 + $0x78] sm:$0xff] }
 0x235   : > { %1664 = vmatprep.mubr.f32.mxu0 %v747_v62  ;;  %1836 = vmatprep.subr.bf16.mxu0 %v1835_v63  ;;  %v1883_v40 = vpack.c.bf16 %v1094_v39, %v1093_v38 }
 0x237   : > { %1878 = vmatpush3.bf16.msra.mxu1 %v1875_v58  ;;  %1665 = vmatmul.mubr.f32.gmra.mrb[6].mxu0 %v748_v3 }
 0x238   : > { %1880 = vmatprep.subr.bf16.mxu1 %v1879_v2  ;;  %1838 = vmatpush3.bf16.msra.mxu0 %v1835_v63 }
 0x239   : > { %1667 = vmatprep.mubr.f32.mxu0 %v749_v4  ;;  %1840 = vmatprep.subr.bf16.mxu0 %v1839_v5 }
 0x23b   : > { %1882 = vmatpush3.bf16.msra.mxu1 %v1879_v2  ;;  %1668 = vmatmul.mubr.f32.gmra.mrb[8].mxu0 %v750_v8 }
 0x23c   : > { %1842 = vmatpush3.bf16.msra.mxu0 %v1839_v5  ;;  %1670 = vmatprep.mubr.f32.mxu0 %v751_v9 }
 0x23d   : > { %1844 = vmatprep.subr.bf16.mxu0 %v1843_v10  ;;  %1884 = vmatprep.subr.bf16.mxu1 %v1883_v40 }
 0x23f   : > { %1671 = vmatmul.mubr.f32.gmra.mrb[10].mxu0 %v752_v13  ;;  %1886 = vmatpush3.bf16.msra.mxu1 %v1883_v40 }
 0x240   : > { %1846 = vmatpush3.bf16.msra.mxu0 %v1843_v10  ;;  %1673 = vmatprep.mubr.f32.mxu0 %v753_v14 }
 0x241   : > { %1848 = vmatprep.subr.bf16.mxu0 %v1847_v15 }
 0x243   : > { %1674 = vmatmul.mubr.f32.gmra.mrb[12].mxu0 %v754_v18 }
 0x244   : > { %1850 = vmatpush3.bf16.msra.mxu0 %v1847_v15  ;;  %1676 = vmatprep.mubr.f32.mxu0 %v755_v19 }
 0x245   : > { %1852 = vmatprep.subr.bf16.mxu0 %v1851_v20 }
 0x247   : > { %1677 = vmatmul.mubr.f32.gmra.mrb[14].mxu0 %v756_v21 }
 0x248   : > { %1854 = vmatpush3.bf16.msra.mxu0 %v1851_v20  ;;  %1711 = vmatprep.mubr.f32.mxu0 %v709_v22 }
 0x24b   : > { %1712 = vmatmul.mubr.f32.vlgmr.msra.gmra.mrb[0].mxu0 %v710_v23 }
 0x24c   : > { %1714 = vmatprep.mubr.f32.mxu0 %v711_v24 }
 0x24f   : > { %1715 = vmatmul.mubr.f32.gmra.mrb[2].mxu0 %v712_v25 }
 0x250   : > { %1717 = vmatprep.mubr.f32.mxu0 %v713_v26 }
 0x253   : > { %1718 = vmatmul.mubr.f32.gmra.mrb[4].mxu0 %v714_v27 }
 0x254   : > { %1720 = vmatprep.mubr.f32.mxu0 %v715_v28 }
 0x257   : > { %1721 = vmatmul.mubr.f32.gmra.mrb[6].mxu0 %v716_v29 }
 0x258   : > { %1723 = vmatprep.mubr.f32.mxu0 %v717_v30 }
 0x25b   : > { %1724 = vmatmul.mubr.f32.gmra.mrb[8].mxu0 %v718_v31 }
 0x25c   : > { %1726 = vmatprep.mubr.f32.mxu0 %v719_v32 }
 0x25f   : > { %1727 = vmatmul.mubr.f32.gmra.mrb[10].mxu0 %v720_v33 }
 0x260   : > { %1729 = vmatprep.mubr.f32.mxu0 %v721_v34 }
 0x263   : > { %1730 = vmatmul.mubr.f32.gmra.mrb[12].mxu0 %v722_v35 }
 0x264   : > { %1732 = vmatprep.mubr.f32.mxu0 %v723_v36 }
 0x267   : > { %1733 = vmatmul.mubr.f32.gmra.mrb[14].mxu0 %v724_v37 }
 0x31e   : > { %v1713_v41 = vpop.f32.mrb[0].mxu0 }
 0x31f   : > { %v984_v42 = vpop.f32.mrb[1].mxu0  ;;  %v1064_v44 = vmax.f32 %v1713_v41, 0.0 }
 0x320   : > { %v1063_v43 = vmax.f32 %v984_v42, 0.0 }
 0x322   : > { %v1716_v45 = vpop.f32.mrb[2].mxu0  ;;  %1767 = vmatprep.mubr.f32.mxu1 %v1063_v43 }
 0x323   : > { %v994_v46 = vpop.f32.mrb[3].mxu0  ;;  %1768 = vmatmul.mubr.f32.vlgmr.msra.gmra.mrb[0].mxu1 %v1064_v44  ;;  %v1066_v48 = vmax.f32 %v1716_v45, 0.0 }
 0x324   : > { %v1065_v47 = vmax.f32 %v994_v46, 0.0 }
 0x326   : > { %v1719_v49 = vpop.f32.mrb[4].mxu0  ;;  %1770 = vmatprep.mubr.f32.mxu1 %v1065_v47 }
 0x327   : > { %v1004_v50 = vpop.f32.mrb[5].mxu0  ;;  %1771 = vmatmul.mubr.f32.gmra.mrb[2].mxu1 %v1066_v48  ;;  %v1068_v52 = vmax.f32 %v1719_v49, 0.0 }
 0x328   : > { %v1067_v51 = vmax.f32 %v1004_v50, 0.0 }
 0x32a   : > { %v1722_v53 = vpop.f32.mrb[6].mxu0  ;;  %1773 = vmatprep.mubr.f32.mxu1 %v1067_v51 }
 0x32b   : > { %v1014_v54 = vpop.f32.mrb[7].mxu0  ;;  %1774 = vmatmul.mubr.f32.gmra.mrb[4].mxu1 %v1068_v52  ;;  %v1070_v56 = vmax.f32 %v1722_v53, 0.0 }
 0x32c   : > { %v1069_v55 = vmax.f32 %v1014_v54, 0.0 }
 0x32e   : > { %v1725_v57 = vpop.f32.mrb[8].mxu0  ;;  %1776 = vmatprep.mubr.f32.mxu1 %v1069_v55 }
 0x32f   : > { %v1024_v58 = vpop.f32.mrb[9].mxu0  ;;  %1777 = vmatmul.mubr.f32.gmra.mrb[6].mxu1 %v1070_v56  ;;  %v1072_v60 = vmax.f32 %v1725_v57, 0.0 }
 0x330   : > { %v1071_v59 = vmax.f32 %v1024_v58, 0.0 }
 0x332   : > { %v1728_v61 = vpop.f32.mrb[10].mxu0  ;;  %1779 = vmatprep.mubr.f32.mxu1 %v1071_v59 }
 0x333   : > { %v1034_v62 = vpop.f32.mrb[11].mxu0  ;;  %1780 = vmatmul.mubr.f32.gmra.mrb[8].mxu1 %v1072_v60  ;;  %v1074_v0 = vmax.f32 %v1728_v61, 0.0 }
 0x334   : > { %v1073_v63 = vmax.f32 %v1034_v62, 0.0 }
 0x336   : > { %v1731_v1 = vpop.f32.mrb[12].mxu0  ;;  %1782 = vmatprep.mubr.f32.mxu1 %v1073_v63 }
 0x337   : > { %v1044_v2 = vpop.f32.mrb[13].mxu0  ;;  %1783 = vmatmul.mubr.f32.gmra.mrb[10].mxu1 %v1074_v0  ;;  %v1076_v4 = vmax.f32 %v1731_v1, 0.0 }
 0x338   : > { %v1075_v3 = vmax.f32 %v1044_v2, 0.0 }
 0x33a   : > { %v1734_v5 = vpop.f32.mrb[14].mxu0  ;;  %1785 = vmatprep.mubr.f32.mxu1 %v1075_v3 }
 0x33b   : > { %v1054_v6 = vpop.f32.mrb[15].mxu0  ;;  %1786 = vmatmul.mubr.f32.gmra.mrb[12].mxu1 %v1076_v4  ;;  %v1078_v8 = vmax.f32 %v1734_v5, 0.0 }
 0x33c   : > { %v1077_v7 = vmax.f32 %v1054_v6, 0.0 }
 0x33e   : > { %1788 = vmatprep.mubr.f32.mxu1 %v1077_v7 }
 0x33f   : > { %1789 = vmatmul.mubr.f32.gmra.mrb[14].mxu1 %v1078_v8 }
 0x3f6   : > { %v1769_v9 = vpop.f32.mrb[0].mxu1 }
 0x3f7   : > { %1241 = vst [vmem:[%s2925_s24 + $0x8] sm:$0xff] %v1769_v9  ;;  %v1161_v10 = vpop.f32.mrb[1].mxu1 }
 0x3f8   : > { %1240 = vst [vmem:[%s2925_s24] sm:$0xff] %v1161_v10 }
 0x3fa   : > { %v1772_v11 = vpop.f32.mrb[2].mxu1 }
 0x3fb   : > { %1243 = vst [vmem:[%s2925_s24 + $0x18] sm:$0xff] %v1772_v11  ;;  %v1171_v12 = vpop.f32.mrb[3].mxu1 }
 0x3fc   : > { %1242 = vst [vmem:[%s2925_s24 + $0x10] sm:$0xff] %v1171_v12 }
 0x3fe   : > { %v1775_v13 = vpop.f32.mrb[4].mxu1 }
 0x3ff   : > { %1245 = vst [vmem:[%s2925_s24 + $0x28] sm:$0xff] %v1775_v13  ;;  %v1181_v14 = vpop.f32.mrb[5].mxu1 }
 0x400   : > { %1244 = vst [vmem:[%s2925_s24 + $0x20] sm:$0xff] %v1181_v14 }
 0x402   : > { %v1778_v15 = vpop.f32.mrb[6].mxu1 }
 0x403   : > { %1247 = vst [vmem:[%s2925_s24 + $0x38] sm:$0xff] %v1778_v15  ;;  %v1191_v16 = vpop.f32.mrb[7].mxu1 }
 0x404   : > { %1246 = vst [vmem:[%s2925_s24 + $0x30] sm:$0xff] %v1191_v16 }
 0x406   : > { %v1781_v17 = vpop.f32.mrb[8].mxu1 }
 0x407   : > { %1249 = vst [vmem:[%s2925_s24 + $0x48] sm:$0xff] %v1781_v17  ;;  %v1201_v18 = vpop.f32.mrb[9].mxu1 }
 0x408   : > { %1248 = vst [vmem:[%s2925_s24 + $0x40] sm:$0xff] %v1201_v18 }
 0x40a   : > { %v1784_v19 = vpop.f32.mrb[10].mxu1 }
 0x40b   : > { %1251 = vst [vmem:[%s2925_s24 + $0x58] sm:$0xff] %v1784_v19  ;;  %v1211_v20 = vpop.f32.mrb[11].mxu1 }
 0x40c   : > { %1250 = vst [vmem:[%s2925_s24 + $0x50] sm:$0xff] %v1211_v20 }
 0x40e   : > { %v1787_v21 = vpop.f32.mrb[12].mxu1 }
 0x40f   : > { %1253 = vst [vmem:[%s2925_s24 + $0x68] sm:$0xff] %v1787_v21  ;;  %v1221_v22 = vpop.f32.mrb[13].mxu1 }
 0x410   : > { %1252 = vst [vmem:[%s2925_s24 + $0x60] sm:$0xff] %v1221_v22 }
 0x412   : > { %v1790_v23 = vpop.f32.mrb[14].mxu1 }
 0x413   : > { %1255 = vst [vmem:[%s2925_s24 + $0x78] sm:$0xff] %v1790_v23  ;;  %v1231_v24 = vpop.f32.mrb[15].mxu1 }
 0x414   : > { %1254 = vst [vmem:[%s2925_s24 + $0x70] sm:$0xff] %v1231_v24 }
 0x415 PF: > { %s3165_s22 = sld [smem:[#allocation26_spill]]  ;;  %s3166_s9 = sld [smem:[#allocation39_spill]] }
 0x416   : > { %s1270_s1 = sshll.u32 %s2925_s24, 4  ;;  %s1257_s20 = scalar_lea.sflag [#allocation5], %s2892_s12  ;;  %s2984_s1 = int_to_ptr.vmem [resolvable:$true] %s1270_s1 }
 0x417   : > { %s2285_s6 = scalar_lea.vmem %s2984_s1, 2048  ;;  %p3168_p0 = scmp.ne.s32.totalorder %s3132_s16, 0 }
 0x418   : > { %p2286_p6 = scmp.ne.s32.totalorder %s2984_s1, %s2285_s6  ;;  %s2461_s15 = smov [#allocation14]  }
 0x419   : > { %s2289_s21 = sshll.u32 %s2461_s15, 4  ;;  %s2290_s21 = int_to_ptr.vmem [resolvable:$false] %s2289_s21 }
 0x41a   : > { %p2287_p4 = pnand %p2286_p6, %p3168_p0  ;;  %s2291_s7 = scalar_lea.vmem %s2290_s21, 4096 }
 0x41b   : > { %s1478_s30 = sshll.u32 %s3165_s22, 11  ;;  %s3167_s2 = smov %s3166_s9 }
 0x41c   : > { %s2981_s0 = scalar_lea.hbm %s3166_s9, %s1478_s30  ;;  %p2288_p11 = pneg %p2287_p4 }
 0x41d   : > { %p2292_p8 = scmp.lt.s32.totalorder %s2984_s1, %s2290_s21  ;;  %p2293_p12 = scmp.lt.s32.totalorder %s2291_s7, %s2285_s6 }
 0x41f   : > { %p2294_p9 = por %p2293_p12, %p2292_p8 }
 0x421   : > { %p2295_p1 = pnand %p2294_p9, %p2288_p11 }
 0x423   : > { %2298 = shalt.err (!%p2295_p1)
}
 0x424   : > { %s2299_s23 = scalar_lea.hbm %s2981_s0, 2048  ;;  %s2303_s24 = scalar_lea.hbm %s3167_s2, 6144 }
 0x425   : > { %p2300_p13 = scmp.ne.s32.totalorder %s2981_s0, %s2299_s23  ;;  %p2304_p10 = scmp.lt.u32.totalorder %s2981_s0, %s3167_s2 }
 0x426   : > { %p2305_p3 = scmp.lt.u32.totalorder %s2303_s24, %s2299_s23  ;;  %p2307_p6 = scmp.lt.u32.totalorder %s2299_s23, %s2981_s0 }
 0x427   : > { %p2301_p5 = pnand %p2300_p13, %p3168_p0 }
 0x428   : > { %p2306_p7 = por %p2305_p3, %p2304_p10 }
 0x429   : > { %p2302_p2 = pneg %p2301_p5 }
 0x42a   : > { %p2308_p4 = por %p2307_p6, %p2306_p7 }
 0x42c   : > { %p2309_p11 = pnand %p2308_p4, %p2302_p2 }
 0x42e   : > { %2312 = shalt.err (!%p2309_p11)
}
 0x42f   : > { %s2462_s22 = smov 128   ;;  %s2463_s30 = smov 8  }
 0x430   : > { %1938 = dma.vmem_to_hbm [thread:$0]  (%p3168_p0), %s2984_s1, 2048, %s2981_s0, %s1257_s20, %s2462_s22, %s2462_s22, %s2463_s30  }
 0x431 PF: > { %p1971_p8 = scmp.ge.s32.totalorder %s2447_s10, 2  ;;  %s1285_s5 = sand.u32 1, %s2419_s27  }
 0x432   : > { %p3169_p12 = scmp.ne.s32.totalorder %s3135_s14, 0  ;;  %s1286_s4 = scalar_lea.sflag [#allocation5], %s1285_s5 }
 0x434   : > { %p1961_p9 = pnand %p1971_p8, %p3169_p12 }
 0x436   : > { %2390 = dma.done.wait (!%p1961_p9), %s1286_s4, 2048  }
 0x437   : > { %2392 = vsyncadd (!%p1961_p9), %s1286_s4, 4294965248  ;;  %s27_s10 = sadd.s32 1, %s2447_s10   ;;  %s3171_s21 = sld [smem:[#allocation22_spill]] }
 0x438   : > { %p3015_p1 = scmp.ge.s32.totalorder %s27_s10, 11   ;;  %s3172_s22 = sld [smem:[#allocation23_spill]] }
 0x439   : > { %s3173_s24 = sld [smem:[#allocation24_spill]]  ;;  %s3174_s16 = smov %s2656_s25 }
 0x43a   : > { %s3175_s12 = sld [smem:[#allocation32_spill]]  ;;  %s3176_s7 = sld [smem:[#allocation27_spill]] }
 0x43b   : > { %s3177_s14 = sld [smem:[#allocation29_spill]]  ;;  %s3178_s0 = sld [smem:[#allocation30_spill]] }
 0x43c   : > { %s3180_s23 = smov %s2833_s17  ;;  %s3181_s25 = smov %s2415_s26 }
 0x43d   : > { %s3182_s26 = smov %s3174_s16  ;;  %s3183_s27 = smov %s2423_s28 }
 0x43e   : > { %s3184_s28 = smov %s2427_s29  ;;  %s3186_s30 = smov %s2439_s8 }
 0x43f   :  { %26 = sbr.rel (!%p3015_p1) target bundleno = 22 (0x16), region = 133 }
 0x440   : > { %s3185_s29 = smov %s3175_s12 }
 0x441   : > { %s3187_s8 = smov %s3177_s14  ;;  %s3188_s9 = smov %s3178_s0 }
 0x446   :  { %1291 = vsyncpa [#allocation4], 1 }
 0x447   :  { %1293 = vsyncpa [#allocation4 + $0x1], 1 }
 0x448   :  { %1294 = vsyncpa [#allocation7], 1 }
 0x449   :  { %1296 = vsyncpa [#allocation7 + $0x1], 1 }
 0x44a   :  { %1297 = vsyncpa [#allocation10], 1 }
 0x44b   :  { %1298 = vsyncpa [#allocation13], 1 }
 0x44c   :  { %1299 = vsyncpa [#allocation5], 1 }
 0x44d   :  { %1301 = vsyncpa [#allocation5 + $0x1], 1 }

</bundles_post_ra>
